<compile_context>
chip_gen: v5e
topology: v5e:2x2
jax: 0.10.0
libtpu: 0.0.40
codegen_flags: <defaults>
</compile_context>

<pallas_src>
import jax
import jax.numpy as jnp
from jax.experimental import pallas as pl
from jax.experimental.pallas import tpu as pltpu


def _identity_copy_kernel(x_hbm_ref, o_hbm_ref, copy_sem):
    # Single whole-tensor HBM -> HBM DMA (identity).
    cp = pltpu.make_async_copy(x_hbm_ref, o_hbm_ref, copy_sem)
    cp.start()
    cp.wait()


def dummy_transformer_block(x):
    """Identity forward of DummyTransformerBlock executed via a Pallas kernel.

    Accepts any shape/dtype; returns an array identical to x.
    """
    total_bytes = x.size * jnp.dtype(x.dtype).itemsize
    return pl.pallas_call(
        _identity_copy_kernel,
        out_shape=jax.ShapeDtypeStruct(x.shape, x.dtype),
        in_specs=[pl.BlockSpec(memory_space=pl.ANY)],
        out_specs=pl.BlockSpec(memory_space=pl.ANY),
        scratch_shapes=[pltpu.SemaphoreType.DMA(())],
        cost_estimate=pl.CostEstimate(
            flops=0,
            transcendentals=0,
            bytes_accessed=2 * total_bytes,   # one HBM read + one HBM write
        ),
    )(x)


if __name__ == "__main__":
    # DummyTransformerBlock has no parameters (its __init__ only calls super()),
    # so there is nothing to initialize.
    key = jax.random.PRNGKey(0)
    batch, seq, emb = 2, 8, 32
    x = jax.random.normal(key, (batch, seq, emb), dtype=jnp.float32)

    y = dummy_transformer_block(x)
    y = jax.block_until_ready(y)

    assert y.shape == x.shape and y.dtype == x.dtype
    assert bool(jnp.array_equal(y, x))
    print("KERNEL_OK")
</pallas_src>

<mosaic_0001>
module attributes {stable_mosaic.version = 11 : i64} {
  func.func @_identity_copy_kernel(%arg0: memref<2x8x32xf32, #tpu.memory_space<any>>, %arg1: memref<2x8x32xf32, #tpu.memory_space<any>>, %arg2: memref<!tpu.dma_semaphore, #tpu.memory_space<semaphore_mem>>) attributes {dimension_semantics = [], scalar_prefetch = 0 : i64, scratch_operands = 1 : i64, tpu.core_type = #tpu.core_type<tc>} {
    tpu.enqueue_dma source(%arg0 : memref<2x8x32xf32, #tpu.memory_space<any>>) target(%arg1 : memref<2x8x32xf32, #tpu.memory_space<any>>) target_semaphore(%arg2 : memref<!tpu.dma_semaphore, #tpu.memory_space<semaphore_mem>>)
    tpu.wait_dma2 semaphore(%arg2 : memref<!tpu.dma_semaphore, #tpu.memory_space<semaphore_mem>>) src(%arg0 : memref<2x8x32xf32, #tpu.memory_space<any>>) dst(%arg1 : memref<2x8x32xf32, #tpu.memory_space<any>>)
    return
  }
}

</mosaic_0001>

<bundles_post_ra>
// kernel: tpu_custom_call.1
= control target key start
LH: loop header
LB: loop body
LE: loop exit
PB: predicated region body
PF: predicated region fallthrough
CT: control target
= control target key end

     0   :  { %s33_s12 = smov [#allocation2]   ;;  %s34_s13 = smov [#allocation3]   ;;  %s52_s0 = inlined_call_operand.hbm [shape: f32[2,8,32], index: 0, kind: input, shape index: {}]   ;;  %s53_s1 = inlined_call_operand.hbm [shape: f32[2,8,32], index: 1, kind: output, shape index: {}]  }
   0x1   :  { %s10_s8 = sshll.u32 %s52_s0, 4  ;;  %s12_s11 = sshll.u32 %s53_s1, 4  ;;  %s11_s8 = int_to_ptr.hbm [resolvable:$true] %s10_s8  ;;  %s13_s11 = int_to_ptr.hbm [resolvable:$true] %s12_s11 }
   0x2   :  { %s35_s14 = smov 0  }
   0x3   :  { %16 = dma.general %s11_s8, 256, %s13_s11, %s33_s12, %s34_s13, [#allocation4], %s35_s14, 0  }
   0x4   :  { %31 = dma.done.wait [#allocation2], 256 }
   0x5   :  { %32 = vsyncadd [#allocation2], 4294967040 }
   0x6   :  { %21 = vsyncmov [#allocation2] }
   0x9   :  { %s22_s15 = vpop.sfrf %21 }
   0xa   :  { %p27_p0 = scmp.ne.s32.totalorder %s22_s15, 0 }
   0xc   :  { %26 = shalt.err (%p27_p0)  }

</bundles_post_ra>
